<compile_context>
chip_gen: v7x
topology: tpu7x:2x2x1
jax: 0.10.0
libtpu: 0.0.40
codegen_flags: <defaults>
</compile_context>

<pallas_src>
import jax
import jax.numpy as jnp
from jax.experimental import pallas as pl
from jax.experimental.pallas import tpu as pltpu


def _make_weight_sum_kernel(k):
    def kernel(w_ref, *refs):
        # w_ref : SMEM (K,) scalar weights (scalar-prefetched)
        # refs  : K input VMEM tiles (tm, W) + 1 output VMEM tile (tm, W)
        o_ref = refs[-1]
        x_refs = refs[:-1]
        # Seed accumulator from the first term (saves one full-tile VPU pass).
        acc = x_refs[0][...].astype(jnp.float32) * w_ref[0]
        for i in range(1, k):  # K is small & static -> unrolled at trace time
            acc = acc + x_refs[i][...].astype(jnp.float32) * w_ref[i]
        o_ref[...] = acc.astype(o_ref.dtype)

    return kernel


def weight_sum(xs, weights):
    """Compute sum_i xs[i] * weights[i] with a Pallas TPU kernel.

    xs      : list of arrays, all the same shape/dtype
    weights : (K,) float32 array of scalar weights
    """
    k = len(xs)
    assert weights.shape == (k,)
    orig_shape = xs[0].shape
    dtype = xs[0].dtype
    itemsize = jnp.dtype(dtype).itemsize

    total = 1
    for d in orig_shape:
        total *= d

    # --- choose a lane-dense 2D view (m, W) -------------------------------
    LANE = 128
    W = None
    for cand in (2048, 1024, 512, 256, 128):
        if total % cand == 0:
            W = cand
            break
    pad = 0
    if W is None:
        # Fallback: minimal pad to a multiple of 128 lanes (no full-slab pad).
        W = LANE
        padded = pl.cdiv(total, LANE) * LANE
        pad = padded - total
    else:
        padded = total
    m = padded // W

    # --- rows per block: ~2 MiB per buffer, aligned to packed sublane height
    row_align = 8 * max(1, 4 // itemsize)  # 8 (f32), 16 (bf16), 32 (i8)
    target_bytes = 2 * 1024 * 1024
    target_rows = max(row_align,
                      ((target_bytes // (W * itemsize)) // row_align) * row_align)
    if m <= target_rows:
        tm = m  # full extent along rows is always a legal block shape
    else:
        tm = target_rows

    grid = (pl.cdiv(m, tm),)  # ragged last block OK: OOB writes dropped

    # --- VMEM budget: (K inputs + 1 output) double-buffered tiles ---------
    tile_bytes = tm * W * itemsize
    needed = 2 * (k + 1) * tile_bytes
    vmem_limit = min(max(needed + (4 << 20), 32 << 20), 48 << 20)

    # --- 2D views of each input (pure reshape in the common case) ---------
    x2ds = []
    for x in xs:
        xf = x.reshape(total)
        if pad:
            xf = jnp.pad(xf, (0, pad))
        x2ds.append(xf.reshape(m, W))

    in_specs = [pl.BlockSpec((tm, W), lambda i, w: (i, 0)) for _ in range(k)]

    out2d = pl.pallas_call(
        _make_weight_sum_kernel(k),
        out_shape=jax.ShapeDtypeStruct((m, W), dtype),
        grid_spec=pltpu.PrefetchScalarGridSpec(
            num_scalar_prefetch=1,
            grid=grid,
            in_specs=in_specs,
            out_specs=pl.BlockSpec((tm, W), lambda i, w: (i, 0)),
        ),
        compiler_params=pltpu.CompilerParams(
            dimension_semantics=("parallel",),
            vmem_limit_bytes=vmem_limit,
        ),
    )(weights, *x2ds)

    if pad:
        return out2d.reshape(padded)[:total].reshape(orig_shape)
    return out2d.reshape(orig_shape)


if __name__ == "__main__":
    key = jax.random.PRNGKey(0)
    in_degree = 3
    # small NCHW inputs, consistent with typical conv-graph tensors
    shape = (2, 4, 16, 16)

    keys = jax.random.split(key, in_degree)
    xs = [jax.random.normal(keys[i], shape, dtype=jnp.float32)
          for i in range(in_degree)]

    # nn.Parameter(torch.ones(in_degree)) -> deterministic ones init
    weights = jnp.ones((in_degree,), dtype=jnp.float32)

    out = weight_sum(xs, weights)
    out = jax.block_until_ready(out)

    # reference check (pure JAX)
    ref = sum(xs[i] * weights[i] for i in range(in_degree))
    assert out.shape == shape
    assert jnp.allclose(out, ref, atol=1e-5, rtol=1e-5)

    print("KERNEL_OK")
</pallas_src>

<mosaic_0001>
module attributes {stable_mosaic.version = 11 : i64} {
  func.func @kernel(%arg0: i32, %arg1: memref<3xf32, #tpu.memory_space<smem>>, %arg2: memref<1x2048xf32, #tpu.memory_space<vmem>>, %arg3: memref<1x2048xf32, #tpu.memory_space<vmem>>, %arg4: memref<1x2048xf32, #tpu.memory_space<vmem>>, %arg5: memref<1x2048xf32, #tpu.memory_space<vmem>>) attributes {dimension_semantics = [#tpu.dimension_semantics<parallel>], iteration_bounds = array<i64: 1>, scalar_prefetch = 1 : i64, scratch_operands = 0 : i64, tpu.core_type = #tpu.core_type<tc>, window_params = [{transform_indices = @transform_0, window_bounds = array<i64: 1, 2048>}, {transform_indices = @transform_1, window_bounds = array<i64: 1, 2048>}, {transform_indices = @transform_2, window_bounds = array<i64: 1, 2048>}, {transform_indices = @transform_3, window_bounds = array<i64: 1, 2048>}]} {
    %c0 = arith.constant 0 : index
    %c0_0 = arith.constant 0 : index
    %0 = vector.load %arg2[%c0, %c0_0] : memref<1x2048xf32, #tpu.memory_space<vmem>>, vector<1x2048xf32>
    %c0_1 = arith.constant 0 : index
    %1 = memref.load %arg1[%c0_1] : memref<3xf32, #tpu.memory_space<smem>>
    %2 = vector.broadcast %1 : f32 to vector<1x2048xf32>
    %3 = arith.mulf %0, %2 : vector<1x2048xf32>
    %c0_2 = arith.constant 0 : index
    %c0_3 = arith.constant 0 : index
    %4 = vector.load %arg3[%c0_2, %c0_3] : memref<1x2048xf32, #tpu.memory_space<vmem>>, vector<1x2048xf32>
    %c1 = arith.constant 1 : index
    %5 = memref.load %arg1[%c1] : memref<3xf32, #tpu.memory_space<smem>>
    %6 = vector.broadcast %5 : f32 to vector<1x2048xf32>
    %7 = arith.mulf %4, %6 : vector<1x2048xf32>
    %8 = arith.addf %3, %7 : vector<1x2048xf32>
    %c0_4 = arith.constant 0 : index
    %c0_5 = arith.constant 0 : index
    %9 = vector.load %arg4[%c0_4, %c0_5] : memref<1x2048xf32, #tpu.memory_space<vmem>>, vector<1x2048xf32>
    %c2 = arith.constant 2 : index
    %10 = memref.load %arg1[%c2] : memref<3xf32, #tpu.memory_space<smem>>
    %11 = vector.broadcast %10 : f32 to vector<1x2048xf32>
    %12 = arith.mulf %9, %11 : vector<1x2048xf32>
    %13 = arith.addf %8, %12 : vector<1x2048xf32>
    %c0_6 = arith.constant 0 : index
    %c0_7 = arith.constant 0 : index
    %14 = vector.load %arg5[%c0_6, %c0_7] : memref<1x2048xf32, #tpu.memory_space<vmem>>, vector<1x2048xf32>
    tpu.vector_store %arg5[%c0_6, %c0_7], %13 {strides = array<i32>} : memref<1x2048xf32, #tpu.memory_space<vmem>>, vector<1x2048xf32>,
    return
  }
  func.func @transform_0(%arg0: i32, %arg1: memref<3xf32, #tpu.memory_space<smem>>) -> (i32, i32) {
    %c0_i32 = arith.constant 0 : i32
    %c0_i32_0 = arith.constant 0 : i32
    return %arg0, %c0_i32 : i32, i32
  }
  func.func @transform_1(%arg0: i32, %arg1: memref<3xf32, #tpu.memory_space<smem>>) -> (i32, i32) {
    %c0_i32 = arith.constant 0 : i32
    %c0_i32_0 = arith.constant 0 : i32
    return %arg0, %c0_i32 : i32, i32
  }
  func.func @transform_2(%arg0: i32, %arg1: memref<3xf32, #tpu.memory_space<smem>>) -> (i32, i32) {
    %c0_i32 = arith.constant 0 : i32
    %c0_i32_0 = arith.constant 0 : i32
    return %arg0, %c0_i32 : i32, i32
  }
  func.func @transform_3(%arg0: i32, %arg1: memref<3xf32, #tpu.memory_space<smem>>) -> (i32, i32) {
    %c0_i32 = arith.constant 0 : i32
    %c0_i32_0 = arith.constant 0 : i32
    return %arg0, %c0_i32 : i32, i32
  }
}

</mosaic_0001>

<bundles_post_ra>
// kernel: tpu_custom_call.1
= control target key start
LH: loop header
LB: loop body
LE: loop exit
PB: predicated region body
PF: predicated region fallthrough
CT: control target
= control target key end

     0   :  { %s298_s0 = inlined_call_operand.hbm [shape: f32[3], index: 0, kind: input, shape index: {}]   ;;  %s299_s1 = inlined_call_operand.hbm [shape: f32[1,2048], index: 1, kind: input, shape index: {}]   ;;  %s300_s2 = inlined_call_operand.hbm [shape: f32[1,2048], index: 2, kind: input, shape index: {}]   ;;  %s301_s3 = inlined_call_operand.hbm [shape: f32[1,2048], index: 3, kind: input, shape index: {}]   ;;  %s302_s4 = inlined_call_operand.hbm [shape: f32[1,2048], index: 4, kind: output, shape index: {}]  }
   0x1   :  { %s102_s17 = scalar_lea.hbm %s298_s0, 16 }
   0x2   :  { %p103_p0 = scmp.ne.s32.totalorder %s298_s0, %s102_s17  ;;  %p106_p1 = scmp.lt.u32.totalorder %s102_s17, %s298_s0 }
   0x4   :  { %p108_p2 = pnand %p106_p1, %p103_p0 }
   0x6   :  { %111 = shalt.err (!%p108_p2)  }
   0x7   :  { %s208_s22 = smov [#allocation3]  }
   0x8   :  { %10 = dma.hbm_to_smem %s298_s0, 16, %s208_s22, [#allocation2] }
   0x9   :  { %200 = dma.done.wait [#allocation2], 16 }
   0xa   :  { %201 = vsyncadd [#allocation2], 4294967280 }
   0xb   :  { %12 = sfence }
   0xc   :  { %13 = vsyncpa [#allocation5], 0 }
   0xd   :  { %14 = vsyncpa [#allocation8], 0 }
   0xe   :  { %15 = vsyncpa [#allocation6], 0  ;;  %s209_s25 = smov [#allocation7]   ;;  %s210_s27 = smov [#allocation4]  }
   0xf   :  { %s32_s26 = sshll.u32 %s209_s25, 4  ;;  %s22_s28 = sshll.u32 %s210_s27, 4  ;;  %s33_s26 = int_to_ptr.vmem [resolvable:$true] %s32_s26  ;;  %s23_s28 = int_to_ptr.vmem [resolvable:$true] %s22_s28 }
  0x10   :  { %s112_s5 = scalar_lea.hbm %s300_s2, 256 }
  0x11   :  { %p113_p3 = scmp.ne.s32.totalorder %s300_s2, %s112_s5  ;;  %p116_p4 = scmp.lt.u32.totalorder %s112_s5, %s300_s2 }
  0x13   :  { %p118_p5 = pnand %p116_p4, %p113_p3 }
  0x15   :  { %121 = shalt.err (!%p118_p5)
}
  0x16   :  { %s122_s9 = scalar_lea.vmem %s33_s26, 256  ;;  %p127_p7 = scmp.lt.s32.totalorder %s33_s26, %s33_s26 }
  0x17   :  { %p123_p6 = scmp.ne.s32.totalorder %s33_s26, %s122_s9  ;;  %p128_p8 = scmp.lt.s32.totalorder %s122_s9, %s122_s9 }
  0x19   :  { %p129_p9 = por %p128_p8, %p127_p7 }
  0x1b   :  { %p130_p10 = pnand %p129_p9, %p123_p6 }
  0x1d   :  { %133 = shalt.err (!%p130_p10)
}
  0x1e   :  { %35 = dma.hbm_to_vmem [thread:$0]  %s300_s2, 256, %s33_s26, [#allocation8]  }
  0x1f   :  { %s134_s14 = scalar_lea.hbm %s299_s1, 256 }
  0x20   :  { %p135_p11 = scmp.ne.s32.totalorder %s299_s1, %s134_s14  ;;  %p138_p12 = scmp.lt.u32.totalorder %s134_s14, %s299_s1 }
  0x22   :  { %p140_p13 = pnand %p138_p12, %p135_p11 }
  0x24   :  { %143 = shalt.err (!%p140_p13)
}
  0x25   :  { %s144_s19 = scalar_lea.vmem %s23_s28, 256  ;;  %p149_p1 = scmp.lt.s32.totalorder %s23_s28, %s23_s28 }
  0x26   :  { %p145_p0 = scmp.ne.s32.totalorder %s23_s28, %s144_s19  ;;  %p150_p2 = scmp.lt.s32.totalorder %s144_s19, %s144_s19 }
  0x28   :  { %p151_p3 = por %p150_p2, %p149_p1 }
  0x2a   :  { %p152_p4 = pnand %p151_p3, %p145_p0 }
  0x2c   :  { %155 = shalt.err (!%p152_p4)
}
  0x2d   :  { %25 = dma.hbm_to_vmem [thread:$0]  %s299_s1, 256, %s23_s28, [#allocation5]  }
  0x2e   :  { %s211_s21 = smov [#allocation9]   ;;  %s156_s25 = scalar_lea.hbm %s301_s3, 256 }
  0x2f   :  { %s42_s22 = sshll.u32 %s211_s21, 4  ;;  %p157_p5 = scmp.ne.s32.totalorder %s301_s3, %s156_s25  ;;  %s43_s22 = int_to_ptr.vmem [resolvable:$true] %s42_s22 }
  0x30   :  { %p160_p6 = scmp.lt.u32.totalorder %s156_s25, %s301_s3 }
  0x32   :  { %p162_p7 = pnand %p160_p6, %p157_p5 }
  0x34   :  { %165 = shalt.err (!%p162_p7)
}
  0x35   :  { %s166_s5 = scalar_lea.vmem %s43_s22, 256  ;;  %p171_p9 = scmp.lt.s32.totalorder %s43_s22, %s43_s22 }
  0x36   :  { %p167_p8 = scmp.ne.s32.totalorder %s43_s22, %s166_s5  ;;  %p172_p10 = scmp.lt.s32.totalorder %s166_s5, %s166_s5 }
  0x38   :  { %p173_p11 = por %p172_p10, %p171_p9 }
  0x3a   :  { %p174_p12 = pnand %p173_p11, %p167_p8 }
  0x3c   :  { %177 = shalt.err (!%p174_p12)
}
  0x3d   :  { %45 = dma.hbm_to_vmem [thread:$0]  %s301_s3, 256, %s43_s22, [#allocation8]  }
  0x3e   :  { %202 = dma.done.wait [#allocation5], 256  }
  0x3f   :  { %203 = vsyncadd [#allocation5], 4294967040 }
  0x40   :  { %204 = dma.done.wait [#allocation8], 512  }
  0x41   :  { %205 = vsyncadd [#allocation8], 4294966784  ;;  %s57_s6 = sld [smem:[#allocation3]]  ;;  %s95_s7 = sld [smem:[#allocation3 + $0x1]]  ;;  %v55_v0 = vld [vmem:[#allocation4] sm:$0xff]  ;;  %v61_v2 = vld [vmem:[#allocation7] sm:$0xff] }
  0x42   :  { %s96_s0 = sld [smem:[#allocation3 + $0x2]]  ;;  %v69_v4 = vld [vmem:[#allocation9] sm:$0xff]  ;;  %v56_v8 = vld [vmem:[#allocation4 + $0x8] sm:$0xff]  ;;  %v62_v9 = vld [vmem:[#allocation7 + $0x8] sm:$0xff]  ;;  %s212_s3 = smov [#allocation10]  }
  0x43   :  { %v70_v10 = vld [vmem:[#allocation9 + $0x8] sm:$0xff]  ;;  %s85_s8 = sshll.u32 %s212_s3, 4  ;;  %s86_s8 = int_to_ptr.vmem [resolvable:$true] %s85_s8 }
  0x44   :  { %s178_s9 = scalar_lea.vmem %s86_s8, 256  ;;  %p183_p0 = scmp.lt.s32.totalorder %s86_s8, %s86_s8 }
  0x45   :  { %p179_p13 = scmp.ne.s32.totalorder %s86_s8, %s178_s9  ;;  %p184_p1 = scmp.lt.s32.totalorder %s178_s9, %s178_s9 }
  0x47   :  { %v58_v1 = vstv %s57_s6  ;;  %v64_v3 = vstv %s95_s7  ;;  %p185_p2 = por %p184_p1, %p183_p0 }
  0x48   :  { %v59_v5 = vmul.f32 %v58_v1, %v55_v0  ;;  %v65_v6 = vmul.f32 %v64_v3, %v61_v2  ;;  %v72_v7 = vstv %s96_s0  ;;  %v60_v12 = vmul.f32 %v58_v1, %v56_v8 }
  0x49   :  { %v73_v11 = vmul.f32 %v72_v7, %v69_v4  ;;  %v66_v13 = vmul.f32 %v64_v3, %v62_v9  ;;  %v74_v14 = vmul.f32 %v72_v7, %v70_v10  ;;  %p186_p3 = pnand %p185_p2, %p179_p13 }
  0x4a   :  { %v67_v15 = vadd.f32 %v65_v6, %v59_v5 }
  0x4b   :  { %v68_v16 = vadd.f32 %v66_v13, %v60_v12 }
  0x4c   :  { %v75_v17 = vadd.f32 %v73_v11, %v67_v15 }
  0x4d   :  { %v76_v18 = vadd.f32 %v74_v14, %v68_v16 }
  0x4e   :  { %77 = vst [vmem:[#allocation10] sm:$0xff] %v75_v17 }
  0x4f   :  { %78 = vst [vmem:[#allocation10 + $0x8] sm:$0xff] %v76_v18 }
  0x50   :  { %189 = shalt.err (!%p186_p3)
}
  0x51   :  { %s190_s12 = scalar_lea.hbm %s302_s4, 256 }
  0x52   :  { %p191_p4 = scmp.ne.s32.totalorder %s302_s4, %s190_s12  ;;  %p194_p5 = scmp.lt.u32.totalorder %s190_s12, %s302_s4 }
  0x54   :  { %p196_p6 = pnand %p194_p5, %p191_p4 }
  0x56   :  { %199 = shalt.err (!%p196_p6)
}
  0x57   :  { %88 = dma.vmem_to_hbm [thread:$0]  %s86_s8, 256, %s302_s4, [#allocation6]  }
  0x58   :  { %206 = dma.done.wait [#allocation6], 256  }
  0x59   :  { %207 = vsyncadd [#allocation6], 4294967040 }
  0x5a   :  { %92 = vsyncpa [#allocation5], 1 }
  0x5b   :  { %93 = vsyncpa [#allocation8], 1 }
  0x5c   :  { %94 = vsyncpa [#allocation6], 1 }

</bundles_post_ra>
